<compile_context>
chip_gen: v7x
topology: tpu7x:2x2x1
jax: 0.10.0
libtpu: 0.0.40
codegen_flags: <defaults>
</compile_context>

<pallas_src>
import jax
import jax.numpy as jnp
from jax.experimental import pallas as pl
from jax.experimental.pallas import tpu as pltpu

_LANE = 128
_LOC = 4  # coordinates per location step


def _build_loss_sum_call(N, C, tile_rows, num_splits, tiles_per_split,
                         logits_dtype, loc_dtype):
    """Returns a pallas_call computing per-split (CE sum, squared-loc-error sum)."""
    loc_block_rows = tile_rows * _LOC // _LANE  # tile_rows % 256 == 0 -> multiple of 8

    def kernel(logits_ref, targets_ref, locp_ref, loct_ref, locm_ref,
               struct_ref, loc_ref):
        s = pl.program_id(0)   # TensorCore split (parallel)
        i = pl.program_id(1)   # row-tile index within split (reduction)

        @pl.when(i == 0)
        def _init():
            struct_ref[0, 0] = jnp.float32(0.0)
            loc_ref[0, 0] = jnp.float32(0.0)

        # ---- cross entropy (reduction='none', summed here) ----
        logits = logits_ref[...].astype(jnp.float32)            # [TN, C]
        targets = targets_ref[...]                               # [TN, 1] i32

        row_max = jnp.max(logits, axis=-1, keepdims=True)         # [TN, 1]
        shifted = logits - row_max
        lse = jnp.log(jnp.sum(jnp.exp(shifted), axis=-1, keepdims=True))  # [TN, 1]
        # target logit gathered from the *shifted* tensor (row_max cancels in CE)
        class_ids = jax.lax.broadcasted_iota(jnp.int32, shifted.shape, 1)
        tgt_shifted = jnp.sum(
            jnp.where(class_ids == targets, shifted, 0.0), axis=-1, keepdims=True)
        ce = lse - tgt_shifted                                    # [TN, 1]

        # mask rows beyond the true N (tail padding of the last tile)
        base = (s * tiles_per_split + i) * tile_rows
        local = jax.lax.broadcasted_iota(jnp.int32, ce.shape, 0)
        valid = (base + local) < N
        struct_ref[0, 0] += jnp.sum(jnp.where(valid, ce, 0.0))

        # ---- masked MSE numerator on lane-dense loc blocks ----
        # padding is all-zero -> pred*mask - tgt == 0 there, contributes nothing
        diff = (locp_ref[...].astype(jnp.float32) * locm_ref[...].astype(jnp.float32)
                - loct_ref[...].astype(jnp.float32))
        loc_ref[0, 0] += jnp.sum(diff * diff)

    row_map = lambda s, i: (s * tiles_per_split + i, 0)
    out_map = lambda s, i: (s, 0)

    # double-buffered input footprint + headroom
    block_bytes = (tile_rows * C * jnp.dtype(logits_dtype).itemsize
                   + tile_rows * 4
                   + 3 * loc_block_rows * _LANE * jnp.dtype(loc_dtype).itemsize)
    vmem_limit = int(min(max(4 * block_bytes + (4 << 20), 16 << 20), 48 << 20))

    return pl.pallas_call(
        kernel,
        grid=(num_splits, tiles_per_split),
        in_specs=[
            pl.BlockSpec((tile_rows, C), row_map),           # logits (native dtype)
            pl.BlockSpec((tile_rows, 1), row_map),           # targets i32
            pl.BlockSpec((loc_block_rows, _LANE), row_map),  # loc preds
            pl.BlockSpec((loc_block_rows, _LANE), row_map),  # loc targets
            pl.BlockSpec((loc_block_rows, _LANE), row_map),  # loc mask
        ],
        out_specs=(
            pl.BlockSpec((1, 1), out_map, memory_space=pltpu.MemorySpace.SMEM),
            pl.BlockSpec((1, 1), out_map, memory_space=pltpu.MemorySpace.SMEM),
        ),
        out_shape=(
            jax.ShapeDtypeStruct((num_splits, 1), jnp.float32),
            jax.ShapeDtypeStruct((num_splits, 1), jnp.float32),
        ),
        compiler_params=pltpu.CompilerParams(
            dimension_semantics=("parallel", "arbitrary"),
            vmem_limit_bytes=vmem_limit,
        ),
    )


def table_attention_loss(predicts, batch, structure_weight, loc_weight):
    """JAX/Pallas port of TableAttentionLoss.forward."""
    structure_probs = predicts["structure_probs"]                # [B, T, C] logits
    loc_preds = predicts["loc_preds"]                            # [B, T, 4]

    structure_targets = batch[1].astype(jnp.int32)[:, 1:]        # [B, T]
    loc_targets = batch[2][:, 1:, :]                             # [B, T, 4] (native dtype)
    loc_targets_mask = batch[3][:, 1:, :]                        # [B, T, 4] (native dtype)

    B, T, C = structure_probs.shape
    N = B * T

    # Row tile: multiple of 256 so the lane-dense loc block has >= 8 sublanes.
    # Sweepable; 512 rows is near the HBM-roofline knee for mem-bound kernels.
    tile_rows = 256 if N <= 256 else 512
    n_tiles = pl.cdiv(N, tile_rows)
    num_splits = 2 if n_tiles >= 2 else 1       # v7x: 2 TensorCores; harmless on v5e/v6e
    tiles_per_split = pl.cdiv(n_tiles, num_splits)
    N_pad = num_splits * tiles_per_split * tile_rows
    pad = N_pad - N

    logits_flat = structure_probs.reshape(N, C)                  # no dtype cast here
    targets_flat = structure_targets.reshape(N, 1)
    if pad:
        logits_flat = jnp.pad(logits_flat, ((0, pad), (0, 0)))
        targets_flat = jnp.pad(targets_flat, ((0, pad), (0, 0)))

    def _lane_dense(x):
        flat = x.reshape(-1)
        if pad:
            flat = jnp.pad(flat, (0, pad * _LOC))
        return flat.reshape(N_pad * _LOC // _LANE, _LANE)

    locp = _lane_dense(loc_preds)
    loct = _lane_dense(loc_targets)
    locm = _lane_dense(loc_targets_mask)

    call = _build_loss_sum_call(N, C, tile_rows, num_splits, tiles_per_split,
                                logits_flat.dtype, loc_preds.dtype)
    struct_parts, loc_parts = call(logits_flat, targets_flat, locp, loct, locm)

    structure_loss = (jnp.sum(struct_parts) / N) * structure_weight
    loc_loss = (jnp.sum(loc_parts) / (N * _LOC)) * loc_weight
    total_loss = structure_loss + loc_loss
    return {
        "loss": total_loss,
        "structure_loss": structure_loss,
        "loc_loss": loc_loss,
    }


def _reference(predicts, batch, structure_weight, loc_weight):
    # pure-JAX reference mirroring the PyTorch module
    logits = predicts["structure_probs"].astype(jnp.float32)
    B, T, C = logits.shape
    tgt = batch[1].astype(jnp.int32)[:, 1:].reshape(-1)
    logits = logits.reshape(-1, C)
    lse = jax.scipy.special.logsumexp(logits, axis=-1)
    ce = lse - jnp.take_along_axis(logits, tgt[:, None], axis=-1)[:, 0]
    structure_loss = jnp.mean(ce) * structure_weight
    loc_p = predicts["loc_preds"].astype(jnp.float32)
    loc_t = batch[2].astype(jnp.float32)[:, 1:, :]
    loc_m = batch[3].astype(jnp.float32)[:, 1:, :]
    loc_loss = jnp.mean((loc_p * loc_m - loc_t) ** 2) * loc_weight
    return structure_loss + loc_loss, structure_loss, loc_loss


if __name__ == "__main__":
    key = jax.random.PRNGKey(0)
    B, T, C = 2, 8, 32                      # batch[k] carries T+1 steps (first dropped)
    structure_weight, loc_weight = 1.0, 2.0

    k1, k2, k3, k4, k5 = jax.random.split(key, 5)
    predicts = {
        "structure_probs": jax.random.normal(k1, (B, T, C), dtype=jnp.float32),
        "loc_preds": jax.random.normal(k2, (B, T, _LOC), dtype=jnp.float32),
    }
    batch = [
        None,                                                          # batch[0] unused
        jax.random.randint(k3, (B, T + 1), 0, C, dtype=jnp.int32),     # structure targets
        jax.random.uniform(k4, (B, T + 1, _LOC), dtype=jnp.float32),   # loc targets
        (jax.random.uniform(k5, (B, T + 1, _LOC)) > 0.5).astype(jnp.float32),  # loc mask
    ]

    out = table_attention_loss(predicts, batch, structure_weight, loc_weight)
    jax.block_until_ready(out["loss"])

    ref_total, ref_struct, ref_loc = _reference(predicts, batch, structure_weight, loc_weight)
    assert jnp.allclose(out["structure_loss"], ref_struct, rtol=1e-5, atol=1e-5)
    assert jnp.allclose(out["loc_loss"], ref_loc, rtol=1e-5, atol=1e-5)
    assert jnp.allclose(out["loss"], ref_total, rtol=1e-5, atol=1e-5)

    # bf16 activation path: no host-side f32 copies, cast happens inside the kernel
    predicts_bf16 = {
        "structure_probs": predicts["structure_probs"].astype(jnp.bfloat16),
        "loc_preds": predicts["loc_preds"].astype(jnp.bfloat16),
    }
    out16 = table_attention_loss(predicts_bf16, batch, structure_weight, loc_weight)
    jax.block_until_ready(out16["loss"])
    ref16_total, _, _ = _reference(predicts_bf16, batch, structure_weight, loc_weight)
    assert jnp.allclose(out16["loss"], ref16_total, rtol=2e-4, atol=2e-4)

    print("KERNEL_OK")
</pallas_src>

<mosaic_0001>
module attributes {stable_mosaic.version = 11 : i64} {
  func.func @kernel(%arg0: i32, %arg1: i32, %arg2: memref<256x32xf32, #tpu.memory_space<vmem>>, %arg3: memref<256x1xi32, #tpu.memory_space<vmem>>, %arg4: memref<8x128xf32, #tpu.memory_space<vmem>>, %arg5: memref<8x128xf32, #tpu.memory_space<vmem>>, %arg6: memref<8x128xf32, #tpu.memory_space<vmem>>, %arg7: memref<1x1xf32, #tpu.memory_space<smem>>, %arg8: memref<1x1xf32, #tpu.memory_space<smem>>) attributes {dimension_semantics = [#tpu.dimension_semantics<parallel>, #tpu.dimension_semantics<arbitrary>], iteration_bounds = array<i64: 1, 1>, scalar_prefetch = 0 : i64, scratch_operands = 0 : i64, tpu.core_type = #tpu.core_type<tc>, window_params = [{transform_indices = @transform_0, window_bounds = array<i64: 256, 32>}, {transform_indices = @transform_1, window_bounds = array<i64: 256, 1>}, {transform_indices = @transform_2, window_bounds = array<i64: 8, 128>}, {transform_indices = @transform_3, window_bounds = array<i64: 8, 128>}, {transform_indices = @transform_4, window_bounds = array<i64: 8, 128>}, {transform_indices = @transform_5, window_bounds = array<i64: 1, 1>}, {transform_indices = @transform_6, window_bounds = array<i64: 1, 1>}]} {
    %c0_i32 = arith.constant 0 : i32
    %0 = arith.cmpi eq, %arg1, %c0_i32 : i32
    %1 = arith.extui %0 : i1 to i32
    %c0_i32_0 = arith.constant 0 : i32
    %2 = arith.cmpi ne, %1, %c0_i32_0 : i32
    scf.if %2 {
      %cst_24 = arith.constant 0.000000e+00 : f32
      %c0_25 = arith.constant 0 : index
      %c0_26 = arith.constant 0 : index
      %51 = memref.load %arg7[%c0_25, %c0_26] : memref<1x1xf32, #tpu.memory_space<smem>>
      memref.store %cst_24, %arg7[%c0_25, %c0_26] : memref<1x1xf32, #tpu.memory_space<smem>>
      %cst_27 = arith.constant 0.000000e+00 : f32
      %c0_28 = arith.constant 0 : index
      %c0_29 = arith.constant 0 : index
      %52 = memref.load %arg8[%c0_28, %c0_29] : memref<1x1xf32, #tpu.memory_space<smem>>
      memref.store %cst_27, %arg8[%c0_28, %c0_29] : memref<1x1xf32, #tpu.memory_space<smem>>
    } else {
    }
    %c0 = arith.constant 0 : index
    %c0_1 = arith.constant 0 : index
    %3 = vector.load %arg2[%c0, %c0_1] : memref<256x32xf32, #tpu.memory_space<vmem>>, vector<256x32xf32>
    %c0_2 = arith.constant 0 : index
    %c0_3 = arith.constant 0 : index
    %4 = vector.load %arg3[%c0_2, %c0_3] : memref<256x1xi32, #tpu.memory_space<vmem>>, vector<256x1xi32>
    %cst = arith.constant dense<0xFF800000> : vector<256xf32>
    %5 = vector.multi_reduction <maximumf>, %3, %cst [1] : vector<256x32xf32> to vector<256xf32>
    %6 = vector.shape_cast %5 : vector<256xf32> to vector<256x1xf32>
    %7 = vector.broadcast %6 : vector<256x1xf32> to vector<256x32xf32>
    %8 = arith.subf %3, %7 : vector<256x32xf32>
    %9 = math.exp %8 : vector<256x32xf32>
    %cst_4 = arith.constant dense<0.000000e+00> : vector<256xf32>
    %10 = vector.multi_reduction <add>, %9, %cst_4 [1] : vector<256x32xf32> to vector<256xf32>
    %11 = vector.shape_cast %10 : vector<256xf32> to vector<256x1xf32>
    %12 = math.log %11 : vector<256x1xf32>
    %13 = tpu.iota {dimensions = array<i32: 1>} : vector<256x32xi32>
    %14 = vector.broadcast %4 : vector<256x1xi32> to vector<256x32xi32>
    %15 = arith.cmpi eq, %13, %14 : vector<256x32xi32>
    %cst_5 = arith.constant 0.000000e+00 : f32
    %16 = vector.broadcast %cst_5 : f32 to vector<256x32xf32>
    %17 = arith.select %15, %8, %16 : vector<256x32xi1>, vector<256x32xf32>
    %cst_6 = arith.constant dense<0.000000e+00> : vector<256xf32>
    %18 = vector.multi_reduction <add>, %17, %cst_6 [1] : vector<256x32xf32> to vector<256xf32>
    %19 = vector.shape_cast %18 : vector<256xf32> to vector<256x1xf32>
    %20 = arith.subf %12, %19 : vector<256x1xf32>
    %c1_i32 = arith.constant 1 : i32
    %21 = arith.muli %arg0, %c1_i32 : i32
    %22 = arith.addi %21, %arg1 : i32
    %c256_i32 = arith.constant 256 : i32
    %23 = arith.muli %22, %c256_i32 : i32
    %24 = tpu.iota {dimensions = array<i32: 0>} : vector<256x1xi32>
    %25 = vector.broadcast %23 : i32 to vector<256x1xi32>
    %26 = arith.addi %25, %24 : vector<256x1xi32>
    %c16_i32 = arith.constant 16 : i32
    %27 = vector.broadcast %c16_i32 : i32 to vector<256x1xi32>
    %28 = arith.cmpi slt, %26, %27 : vector<256x1xi32>
    %c0_7 = arith.constant 0 : index
    %c0_8 = arith.constant 0 : index
    %29 = memref.load %arg7[%c0_7, %c0_8] : memref<1x1xf32, #tpu.memory_space<smem>>
    %cst_9 = arith.constant 0.000000e+00 : f32
    %30 = vector.broadcast %cst_9 : f32 to vector<256x1xf32>
    %31 = arith.select %28, %20, %30 : vector<256x1xi1>, vector<256x1xf32>
    %32 = vector.shape_cast %31 : vector<256x1xf32> to vector<1x256x1xf32>
    %cst_10 = arith.constant dense<0.000000e+00> : vector<1xf32>
    %33 = vector.multi_reduction <add>, %32, %cst_10 [1, 2] : vector<1x256x1xf32> to vector<1xf32>
    %34 = vector.shape_cast %33 : vector<1xf32> to vector<1x1x1xf32>
    %35 = vector.extract %34[0, 0, 0] : f32 from vector<1x1x1xf32>
    %36 = arith.addf %29, %35 : f32
    %c0_11 = arith.constant 0 : index
    %c0_12 = arith.constant 0 : index
    %37 = memref.load %arg7[%c0_11, %c0_12] : memref<1x1xf32, #tpu.memory_space<smem>>
    memref.store %36, %arg7[%c0_11, %c0_12] : memref<1x1xf32, #tpu.memory_space<smem>>
    %c0_13 = arith.constant 0 : index
    %c0_14 = arith.constant 0 : index
    %38 = vector.load %arg4[%c0_13, %c0_14] : memref<8x128xf32, #tpu.memory_space<vmem>>, vector<8x128xf32>
    %c0_15 = arith.constant 0 : index
    %c0_16 = arith.constant 0 : index
    %39 = vector.load %arg6[%c0_15, %c0_16] : memref<8x128xf32, #tpu.memory_space<vmem>>, vector<8x128xf32>
    %40 = arith.mulf %38, %39 : vector<8x128xf32>
    %c0_17 = arith.constant 0 : index
    %c0_18 = arith.constant 0 : index
    %41 = vector.load %arg5[%c0_17, %c0_18] : memref<8x128xf32, #tpu.memory_space<vmem>>, vector<8x128xf32>
    %42 = arith.subf %40, %41 : vector<8x128xf32>
    %c0_19 = arith.constant 0 : index
    %c0_20 = arith.constant 0 : index
    %43 = memref.load %arg8[%c0_19, %c0_20] : memref<1x1xf32, #tpu.memory_space<smem>>
    %44 = arith.mulf %42, %42 : vector<8x128xf32>
    %45 = vector.shape_cast %44 : vector<8x128xf32> to vector<1x8x128xf32>
    %cst_21 = arith.constant dense<0.000000e+00> : vector<1xf32>
    %46 = vector.multi_reduction <add>, %45, %cst_21 [1, 2] : vector<1x8x128xf32> to vector<1xf32>
    %47 = vector.shape_cast %46 : vector<1xf32> to vector<1x1x1xf32>
    %48 = vector.extract %47[0, 0, 0] : f32 from vector<1x1x1xf32>
    %49 = arith.addf %43, %48 : f32
    %c0_22 = arith.constant 0 : index
    %c0_23 = arith.constant 0 : index
    %50 = memref.load %arg8[%c0_22, %c0_23] : memref<1x1xf32, #tpu.memory_space<smem>>
    memref.store %49, %arg8[%c0_22, %c0_23] : memref<1x1xf32, #tpu.memory_space<smem>>
    return
  }
  func.func @transform_0(%arg0: i32, %arg1: i32) -> (i32, i32) {
    %c1_i32 = arith.constant 1 : i32
    %0 = arith.muli %arg0, %c1_i32 : i32
    %1 = arith.addi %0, %arg1 : i32
    %c0_i32 = arith.constant 0 : i32
    %c0_i32_0 = arith.constant 0 : i32
    return %1, %c0_i32 : i32, i32
  }
  func.func @transform_1(%arg0: i32, %arg1: i32) -> (i32, i32) {
    %c1_i32 = arith.constant 1 : i32
    %0 = arith.muli %arg0, %c1_i32 : i32
    %1 = arith.addi %0, %arg1 : i32
    %c0_i32 = arith.constant 0 : i32
    %c0_i32_0 = arith.constant 0 : i32
    return %1, %c0_i32 : i32, i32
  }
  func.func @transform_2(%arg0: i32, %arg1: i32) -> (i32, i32) {
    %c1_i32 = arith.constant 1 : i32
    %0 = arith.muli %arg0, %c1_i32 : i32
    %1 = arith.addi %0, %arg1 : i32
    %c0_i32 = arith.constant 0 : i32
    %c0_i32_0 = arith.constant 0 : i32
    return %1, %c0_i32 : i32, i32
  }
  func.func @transform_3(%arg0: i32, %arg1: i32) -> (i32, i32) {
    %c1_i32 = arith.constant 1 : i32
    %0 = arith.muli %arg0, %c1_i32 : i32
    %1 = arith.addi %0, %arg1 : i32
    %c0_i32 = arith.constant 0 : i32
    %c0_i32_0 = arith.constant 0 : i32
    return %1, %c0_i32 : i32, i32
  }
  func.func @transform_4(%arg0: i32, %arg1: i32) -> (i32, i32) {
    %c1_i32 = arith.constant 1 : i32
    %0 = arith.muli %arg0, %c1_i32 : i32
    %1 = arith.addi %0, %arg1 : i32
    %c0_i32 = arith.constant 0 : i32
    %c0_i32_0 = arith.constant 0 : i32
    return %1, %c0_i32 : i32, i32
  }
  func.func @transform_5(%arg0: i32, %arg1: i32) -> (i32, i32) {
    %c0_i32 = arith.constant 0 : i32
    %c0_i32_0 = arith.constant 0 : i32
    return %arg0, %c0_i32 : i32, i32
  }
  func.func @transform_6(%arg0: i32, %arg1: i32) -> (i32, i32) {
    %c0_i32 = arith.constant 0 : i32
    %c0_i32_0 = arith.constant 0 : i32
    return %arg0, %c0_i32 : i32, i32
  }
}

</mosaic_0001>

<bundles_post_ra>
// kernel: tpu_custom_call.1
= control target key start
LH: loop header
LB: loop body
LE: loop exit
PB: predicated region body
PF: predicated region fallthrough
CT: control target
= control target key end

     0   :  { %12 = vsyncpa [#allocation3], 0  ;;  %vm191_vm0 = vcmask 261120   ;;  %v1159_v4 = vmov 0   ;;  %s1248_s0 = inlined_call_operand.vmem [shape: f32[256,32], index: 0, kind: input, shape index: {}]   ;;  %s1249_s1 = inlined_call_operand.vmem [shape: s32[256,1], index: 1, kind: input, shape index: {}]   ;;  %s1250_s2 = inlined_call_operand.vmem [shape: f32[8,128], index: 2, kind: input, shape index: {}]   ;;  %s1251_s3 = inlined_call_operand.vmem [shape: f32[8,128], index: 3, kind: input, shape index: {}]   ;;  %s1252_s4 = inlined_call_operand.vmem [shape: f32[8,128], index: 4, kind: input, shape index: {}]   ;;  %s1253_s5 = inlined_call_operand.hbm [shape: f32[1,1], index: 5, kind: output, shape index: {0}]   ;;  %s1254_s6 = inlined_call_operand.hbm [shape: f32[1,1], index: 6, kind: output, shape index: {1}]  }
   0x1   :  { %v127_v0 = vld [vmem:[%s1248_s0] sm:$0xff]  ;;  %v128_v1 = vld [vmem:[%s1248_s0 + $0x8] sm:$0xff]  ;;  %1125 = vset.pattern.permute.xlu1 %v1159_v4  ;;  %1126 = vset.pattern.permute.xlu0 %v1159_v4 }
   0x2   :  { %v159_v2 = vld [vmem:[%s1249_s1] sm:$0xff]  ;;  %v192_v3 = vsel %vm191_vm0, %v127_v0, -inf }
   0x3   :  { %13 = vsyncpa [#allocation5], 0  ;;  %193 = vmax.xlane.f32.xlu0 %v192_v3  ;;  %547 = vperm.xlu1 %1125, %v159_v2   ;;  %v195_v5 = vsel %vm191_vm0, %v128_v1, -inf  ;;  %v160_v6 = vld [vmem:[%s1249_s1 + $0x8] sm:$0xff]  ;;  %v544_v12 = vlaneseq  ;;  %v1043_v30 = vld [vmem:[%s1250_s2] sm:$0xff]  ;;  %vm967_vm3 = vcmask 7168  }
   0x4   :  { %v1044_v31 = vld [vmem:[%s1252_s4] sm:$0xff]  ;;  %s1135_s10 = scalar_lea.hbm %s1253_s5, 16 }
   0x5   :  { %v545_v15 = vand.u32 127, %v544_v12  ;;  %v1045_v33 = vmul.f32 %v1044_v31, %v1043_v30  ;;  %v1046_v36 = vld [vmem:[%s1251_s3] sm:$0xff]  ;;  %p1136_p0 = scmp.ne.s32.totalorder %s1253_s5, %s1135_s10  ;;  %p1139_p1 = scmp.lt.u32.totalorder %s1135_s10, %s1253_s5 }
   0x7   :  { %196 = vmax.xlane.f32.xlu0 %v195_v5  ;;  %550 = vperm.xlu1 %1125, %v160_v6   ;;  %v1047_v39 = vsub.f32 %v1045_v33, %v1046_v36  ;;  %p1141_p2 = pnand %p1139_p1, %p1136_p0 }
   0x9   :  { %v1049_v43 = vmul.f32 %v1047_v39, %v1047_v39 }
  0x82   :  { %v548_v14 = vpop.permute.xlu1 %547 }
  0x83   :  { %vm642_vm1 = vcmp.eq.s32.totalorder %v545_v15, %v548_v14 }
  0x86   :  { %v551_v17 = vpop.permute.xlu1 %550 }
  0x87   :  { %vm643_vm2 = vcmp.eq.s32.totalorder %v545_v15, %v551_v17 }
  0x90   :  { %v194_v7 = vpop.xlane.xlu0 %193 }
  0x91   :  { %v288_v8 = vsub.f32 %v127_v0, %v194_v7 }
  0x93   :  { %v320_v9 = vmul.f32 1.442695, %v288_v8  ;;  %v674_v19 = vsel %vm642_vm1, %v288_v8, 0.0 }
  0x94   :  { %v197_v10 = vpop.xlane.xlu0 %196  ;;  %v706_v21 = vsel %vm191_vm0, %v674_v19, 0.0 }
  0x95   :  { %1127 = vpow2.f32 %v320_v9  ;;  %v289_v11 = vsub.f32 %v128_v1, %v197_v10 }
  0x97   :  { %v322_v13 = vmul.f32 1.442695, %v289_v11  ;;  %v675_v23 = vsel %vm643_vm2, %v289_v11, 0.0 }
  0x98   :  { %v709_v24 = vsel %vm191_vm0, %v675_v23, 0.0 }
  0x99   :  { %1129 = vpow2.f32 %v322_v13 }
  0x9f   :  { %v1128_v16 = vpop.eup %1127 }
  0xa0   :  { %v384_v18 = vsel %vm191_vm0, %v1128_v16, 0.0 }
  0xa1   :  { %385 = vadd.xlane.f32.xlu0 %v384_v18 }
  0xa3   :  { %v1130_v20 = vpop.eup %1129 }
  0xa4   :  { %v387_v22 = vsel %vm191_vm0, %v1130_v20, 0.0 }
  0xa5   :  { %707 = vadd.xlane.f32.xlu0 %v706_v21  ;;  %388 = vadd.xlane.f32.xlu1 %v387_v22 }
  0xa9   :  { %710 = vadd.xlane.f32.xlu0 %v709_v24 }
 0x12e   :  { %v386_v25 = vpop.xlane.xlu0 %385 }
 0x12f   :  { %1131 = vlog2.f32 %v386_v25 }
 0x132   :  { %v389_v26 = vpop.xlane.xlu1 %388  ;;  %v708_v28 = vpop.xlane.xlu0 %707 }
 0x133   :  { %1133 = vlog2.f32 %v389_v26 }
 0x136   :  { %v711_v37 = vpop.xlane.xlu0 %710 }
 0x139   :  { %v1132_v27 = vpop.eup %1131 }
 0x13a   :  { %v481_v29 = vmul.f32 0.6931472, %v1132_v27 }
 0x13c   :  { %v802_v34 = vsub.f32 %v481_v29, %v708_v28 }
 0x13d   :  { %v1134_v32 = vpop.eup %1133 }
 0x13e   :  { %v483_v35 = vmul.f32 0.6931472, %v1134_v32  ;;  %v968_v40 = vsel %vm967_vm3, %v802_v34, 0.0 }
 0x140   :  { %v803_v38 = vsub.f32 %v483_v35, %v711_v37 }
 0x142   :  { %v969_v41 = vsel %vm967_vm3, %v803_v38, 0.0 }
 0x143   :  { %v970_v42 = vadd.f32 %v969_v41, %v968_v40 }
 0x145   :  { %1031 = vadd.xlane.f32.xlu0 %v970_v42 }
 0x149   :  { %1050 = vadd.xlane.f32.xlu0 %v1049_v43 }
 0x1d2   :  { %v1032_v44 = vpop.xlane.xlu0 %1031 }
 0x1d3   :  { %v1033_v45 = vrot.slane %v1032_v44, 4 }
 0x1d5   :  { %v1034_v46 = vadd.f32 %v1033_v45, %v1032_v44 }
 0x1d6   :  { %v1051_v47 = vpop.xlane.xlu0 %1050 }
 0x1d7   :  { %v1035_v48 = vrot.slane %v1034_v46, 2  ;;  %v1052_v49 = vrot.slane %v1051_v47, 4 }
 0x1d9   :  { %v1053_v50 = vadd.f32 %v1052_v49, %v1051_v47  ;;  %v1036_v51 = vadd.f32 %v1035_v48, %v1034_v46 }
 0x1db   :  { %v1054_v52 = vrot.slane %v1053_v50, 2  ;;  %v1037_v53 = vrot.slane %v1036_v51, 1 }
 0x1dd   :  { %v1055_v54 = vadd.f32 %v1054_v52, %v1053_v50  ;;  %v1038_v55 = vadd.f32 %v1037_v53, %v1036_v51 }
 0x1df   :  { %1117 = vpush %v1038_v55  ;;  %v1056_v56 = vrot.slane %v1055_v54, 1 }
 0x1e1   :  { %v1057_v57 = vadd.f32 %v1056_v56, %v1055_v54 }
 0x1e3   :  { %1119 = vpush %v1057_v57 }
 0x210   :  { %s1118_s2 = spop %1117 }
 0x211   :  { %1042 = sst [smem:[#allocation2]] %s1118_s2 }
 0x214   :  { %s1120_s3 = spop %1119 }
 0x215   :  { %1144 = shalt.err (!%p1141_p2)
}
 0x216   :  { %s1160_s15 = smov [#allocation2]   ;;  %1061 = sst [smem:[#allocation4]] %s1120_s3 }
 0x217   :  { %1069 = dma.smem_to_hbm %s1160_s15, 16, %s1253_s5, [#allocation3]  }
 0x218   :  { %s1145_s20 = scalar_lea.hbm %s1254_s6, 16 }
 0x219   :  { %p1146_p3 = scmp.ne.s32.totalorder %s1254_s6, %s1145_s20  ;;  %p1149_p4 = scmp.lt.u32.totalorder %s1145_s20, %s1254_s6 }
 0x21b   :  { %p1151_p5 = pnand %p1149_p4, %p1146_p3 }
 0x21d   :  { %1154 = shalt.err (!%p1151_p5)
}
 0x21e   :  { %s1161_s25 = smov [#allocation4]  }
 0x21f   :  { %1077 = dma.smem_to_hbm %s1161_s25, 16, %s1254_s6, [#allocation5]  }
 0x220   :  { %1155 = dma.done.wait [#allocation3], 16  }
 0x221   :  { %1156 = vsyncadd [#allocation3], 4294967280 }
 0x222   :  { %1157 = dma.done.wait [#allocation5], 16  }
 0x223   :  { %1158 = vsyncadd [#allocation5], 4294967280 }
 0x224   :  { %1084 = sfence }
 0x225   :  { %1085 = vsyncpa [#allocation3], 1 }
 0x226   :  { %1086 = vsyncpa [#allocation5], 1 }

</bundles_post_ra>
